<compile_context>
chip_gen: v7x
topology: tpu7x:2x2x1
jax: 0.10.0
libtpu: 0.0.40
codegen_flags: <defaults>
</compile_context>

<pallas_src>
import functools

import jax
import jax.numpy as jnp
from jax.experimental import pallas as pl
from jax.experimental.pallas import tpu as pltpu


_TARGET_TILE_BYTES = 2 * 1024 * 1024   # ~2 MiB per input block (near-roofline tile)
_MIN_PALLAS_ELEMS = 256 * 1024         # below this, let XLA fuse it instead


def _round_up(x, m):
    return (x + m - 1) // m * m


def _contrastive_loss_kernel(x0_ref, x1_ref, y_ref, out_ref, *, n_valid, tile_n):
    """Per-row BCE-with-logits on cosine-similarity logits for one row tile."""
    x0 = x0_ref[...].astype(jnp.float32)        # (TILE_N, D)
    x1 = x1_ref[...].astype(jnp.float32)        # (TILE_N, D)
    y = y_ref[...]                              # (TILE_N, 1) f32

    eps = jnp.float32(1e-8)

    # Cosine similarity along the last axis (matches torch.nn.CosineSimilarity:
    # dot / sqrt(max(||x0||^2 * ||x1||^2, eps^2))).
    dot = jnp.sum(x0 * x1, axis=-1, keepdims=True)          # (TILE_N, 1)
    sq0 = jnp.sum(x0 * x0, axis=-1, keepdims=True)          # (TILE_N, 1)
    sq1 = jnp.sum(x1 * x1, axis=-1, keepdims=True)          # (TILE_N, 1)
    denom = jnp.sqrt(jnp.maximum(sq0 * sq1, eps * eps))     # (TILE_N, 1)
    z = (dot / denom) / jnp.float32(0.1)                    # logits

    # Numerically stable BCEWithLogitsLoss per element:
    #   l = max(z, 0) - z*y + log1p(exp(-|z|))
    per = jnp.maximum(z, 0.0) - z * y + jnp.log1p(jnp.exp(-jnp.abs(z)))

    # Mask rows that are zero-padding past the true batch size (they would
    # otherwise contribute log(2) each to the mean).
    row = pl.program_id(0) * tile_n + jax.lax.broadcasted_iota(
        jnp.int32, (tile_n, 1), 0)
    out_ref[...] = jnp.where(row < n_valid, per, 0.0)


def _contrastive_loss_pallas(x0, x1, y, _tile_n_override=None):
    N, D = x0.shape
    itemsize = jnp.dtype(x0.dtype).itemsize

    if _tile_n_override is not None:
        tile_n = int(_tile_n_override)
    else:
        # Largest multiple of 8 whose input block is ~2 MiB, capped at the
        # (row-padded) batch size.
        target_rows = max(8, (_TARGET_TILE_BYTES // max(D * itemsize, 1)) // 8 * 8)
        tile_n = int(min(target_rows, _round_up(N, 8)))
    assert tile_n % 8 == 0

    n_pad = _round_up(N, tile_n)
    num_tiles = n_pad // tile_n

    y2 = y.reshape(N, 1).astype(jnp.float32)
    if n_pad != N:
        pad = n_pad - N
        x0 = jnp.pad(x0, ((0, pad), (0, 0)))
        x1 = jnp.pad(x1, ((0, pad), (0, 0)))
        y2 = jnp.pad(y2, ((0, pad), (0, 0)))

    # Scoped-VMEM budget: double-buffered x0/x1 tiles dominate; cap at 32 MiB
    # so it fits v5e (128 MiB phys), v6e (128 MiB) and v7x (64 MiB) alike.
    tile_in_bytes = tile_n * D * itemsize
    footprint = 2 * (2 * tile_in_bytes) + 2 * 2 * (tile_n * 4) * 2
    vmem_limit = int(min(max(4 * footprint, 4 << 20), 32 << 20))

    kernel = functools.partial(_contrastive_loss_kernel, n_valid=N, tile_n=tile_n)

    per_row = pl.pallas_call(
        kernel,
        out_shape=jax.ShapeDtypeStruct((n_pad, 1), jnp.float32),
        grid=(num_tiles,),
        in_specs=[
            pl.BlockSpec((tile_n, D), lambda i: (i, 0)),   # x0 tile
            pl.BlockSpec((tile_n, D), lambda i: (i, 0)),   # x1 tile
            pl.BlockSpec((tile_n, 1), lambda i: (i, 0)),   # y tile
        ],
        out_specs=pl.BlockSpec((tile_n, 1), lambda i: (i, 0)),
        compiler_params=pltpu.CompilerParams(
            dimension_semantics=("parallel",),
            vmem_limit_bytes=vmem_limit,
        ),
    )(x0, x1, y2)

    # Mean over the *global* N (padded rows are already zero), then
    # forward = (loss1 + loss2) / 2 with loss1 == loss2 in the forward pass.
    return jnp.sum(per_row) / jnp.float32(N)


def _reference_loss(x0, x1, y):
    """Pure JAX reference mirroring the PyTorch module."""
    x0 = x0.astype(jnp.float32)
    x1 = x1.astype(jnp.float32)
    y = y.astype(jnp.float32)
    eps = jnp.float32(1e-8)
    dot = jnp.sum(x0 * x1, axis=-1)
    denom = jnp.sqrt(jnp.maximum(jnp.sum(x0 * x0, -1) * jnp.sum(x1 * x1, -1),
                                 eps * eps))
    z = (dot / denom) / jnp.float32(0.1)
    per = jnp.maximum(z, 0.0) - z * y + jnp.log1p(jnp.exp(-jnp.abs(z)))
    loss = jnp.mean(per)
    return (loss + loss) / 2.0


def contrastive_loss(x0, x1, y, margin=1.0, metric="cos", use_pallas=None):
    """Pallas implementation of ContrastiveLoss.forward (cos metric)."""
    assert metric == "cos", "only the 'cos' metric hot path is implemented"
    # TODO(synk): 'l2' metric branch (sqrt mean-squared distance) not implemented.
    assert x0.ndim == 2 and x1.ndim == 2 and y.ndim == 1
    assert x0.shape == x1.shape and x0.shape[0] == y.shape[0] and x0.shape[0] > 0

    N, D = x0.shape
    if use_pallas is None:
        # Tiny problems: pallas_call fixed overhead dominates; let XLA fuse it.
        use_pallas = (N * D) >= _MIN_PALLAS_ELEMS
    if not use_pallas:
        return _reference_loss(x0, x1, y)
    return _contrastive_loss_pallas(x0, x1, y)


if __name__ == "__main__":
    key = jax.random.PRNGKey(0)
    k0, k1, ky, k2, k3, k4 = jax.random.split(key, 6)

    # Case 1: small batch of 8 embedding pairs, hidden dim 32 (single tile).
    N, D = 8, 32
    x0 = jax.random.normal(k0, (N, D), dtype=jnp.float32)
    x1 = jax.random.normal(k1, (N, D), dtype=jnp.float32)
    y = jax.random.bernoulli(ky, 0.5, (N,)).astype(jnp.float32)

    loss = contrastive_loss(x0, x1, y, use_pallas=True)
    loss = jax.block_until_ready(loss)
    ref = _reference_loss(x0, x1, y)
    assert jnp.allclose(loss, ref, atol=1e-5, rtol=1e-5), (loss, ref)

    # Case 2: batch not a multiple of the tile -> exercises the padding mask,
    # the global-N divisor and a multi-step 'parallel' grid.
    N2, D2 = 20, 32
    a0 = jax.random.normal(k2, (N2, D2), dtype=jnp.float32)
    a1 = jax.random.normal(k3, (N2, D2), dtype=jnp.float32)
    yb = jax.random.bernoulli(k4, 0.5, (N2,)).astype(jnp.float32)

    loss2 = _contrastive_loss_pallas(a0, a1, yb, _tile_n_override=8)
    loss2 = jax.block_until_ready(loss2)
    ref2 = _reference_loss(a0, a1, yb)
    assert jnp.allclose(loss2, ref2, atol=1e-5, rtol=1e-5), (loss2, ref2)

    print("KERNEL_OK")
</pallas_src>

<mosaic_0001>
module attributes {stable_mosaic.version = 11 : i64} {
  func.func @_contrastive_loss_kernel(%arg0: i32, %arg1: memref<8x32xf32, #tpu.memory_space<vmem>>, %arg2: memref<8x32xf32, #tpu.memory_space<vmem>>, %arg3: memref<8x1xf32, #tpu.memory_space<vmem>>, %arg4: memref<8x1xf32, #tpu.memory_space<vmem>>) attributes {dimension_semantics = [#tpu.dimension_semantics<parallel>], iteration_bounds = array<i64: 1>, scalar_prefetch = 0 : i64, scratch_operands = 0 : i64, tpu.core_type = #tpu.core_type<tc>, window_params = [{transform_indices = @transform_0, window_bounds = array<i64: 8, 32>}, {transform_indices = @transform_1, window_bounds = array<i64: 8, 32>}, {transform_indices = @transform_2, window_bounds = array<i64: 8, 1>}, {transform_indices = @transform_3, window_bounds = array<i64: 8, 1>}]} {
    %c0 = arith.constant 0 : index
    %c0_0 = arith.constant 0 : index
    %0 = vector.load %arg1[%c0, %c0_0] : memref<8x32xf32, #tpu.memory_space<vmem>>, vector<8x32xf32>
    %c0_1 = arith.constant 0 : index
    %c0_2 = arith.constant 0 : index
    %1 = vector.load %arg2[%c0_1, %c0_2] : memref<8x32xf32, #tpu.memory_space<vmem>>, vector<8x32xf32>
    %c0_3 = arith.constant 0 : index
    %c0_4 = arith.constant 0 : index
    %2 = vector.load %arg3[%c0_3, %c0_4] : memref<8x1xf32, #tpu.memory_space<vmem>>, vector<8x1xf32>
    %3 = arith.mulf %0, %1 : vector<8x32xf32>
    %cst = arith.constant dense<0.000000e+00> : vector<8xf32>
    %4 = vector.multi_reduction <add>, %3, %cst [1] : vector<8x32xf32> to vector<8xf32>
    %5 = vector.shape_cast %4 : vector<8xf32> to vector<8x1xf32>
    %6 = arith.mulf %0, %0 : vector<8x32xf32>
    %cst_5 = arith.constant dense<0.000000e+00> : vector<8xf32>
    %7 = vector.multi_reduction <add>, %6, %cst_5 [1] : vector<8x32xf32> to vector<8xf32>
    %8 = vector.shape_cast %7 : vector<8xf32> to vector<8x1xf32>
    %9 = arith.mulf %1, %1 : vector<8x32xf32>
    %cst_6 = arith.constant dense<0.000000e+00> : vector<8xf32>
    %10 = vector.multi_reduction <add>, %9, %cst_6 [1] : vector<8x32xf32> to vector<8xf32>
    %11 = vector.shape_cast %10 : vector<8xf32> to vector<8x1xf32>
    %12 = arith.mulf %8, %11 : vector<8x1xf32>
    %cst_7 = arith.constant 9.99999993E-9 : f32
    %cst_8 = arith.constant 9.99999993E-9 : f32
    %13 = arith.mulf %cst_7, %cst_8 : f32
    %14 = vector.broadcast %13 : f32 to vector<8x1xf32>
    %15 = arith.maximumf %12, %14 : vector<8x1xf32>
    %16 = math.sqrt %15 : vector<8x1xf32>
    %17 = arith.divf %5, %16 : vector<8x1xf32>
    %cst_9 = arith.constant 1.000000e-01 : f32
    %18 = vector.broadcast %cst_9 : f32 to vector<8x1xf32>
    %19 = arith.divf %17, %18 : vector<8x1xf32>
    %cst_10 = arith.constant 0.000000e+00 : f32
    %20 = vector.broadcast %cst_10 : f32 to vector<8x1xf32>
    %21 = arith.maximumf %19, %20 : vector<8x1xf32>
    %22 = arith.mulf %19, %2 : vector<8x1xf32>
    %23 = arith.subf %21, %22 : vector<8x1xf32>
    %24 = math.absf %19 : vector<8x1xf32>
    %cst_11 = arith.constant 0.000000e+00 : f32
    %25 = vector.broadcast %cst_11 : f32 to vector<8x1xf32>
    %26 = arith.subf %25, %24 : vector<8x1xf32>
    %27 = math.exp %26 : vector<8x1xf32>
    %28 = math.log1p %27 : vector<8x1xf32>
    %29 = arith.addf %23, %28 : vector<8x1xf32>
    %c8_i32 = arith.constant 8 : i32
    %30 = arith.muli %arg0, %c8_i32 : i32
    %31 = tpu.iota {dimensions = array<i32: 0>} : vector<8x1xi32>
    %32 = vector.broadcast %30 : i32 to vector<8x1xi32>
    %33 = arith.addi %32, %31 : vector<8x1xi32>
    %c8_i32_12 = arith.constant 8 : i32
    %34 = vector.broadcast %c8_i32_12 : i32 to vector<8x1xi32>
    %35 = arith.cmpi slt, %33, %34 : vector<8x1xi32>
    %cst_13 = arith.constant 0.000000e+00 : f32
    %36 = vector.broadcast %cst_13 : f32 to vector<8x1xf32>
    %37 = arith.select %35, %29, %36 : vector<8x1xi1>, vector<8x1xf32>
    %c0_14 = arith.constant 0 : index
    %c0_15 = arith.constant 0 : index
    %38 = vector.load %arg4[%c0_14, %c0_15] : memref<8x1xf32, #tpu.memory_space<vmem>>, vector<8x1xf32>
    tpu.vector_store %arg4[%c0_14, %c0_15], %37 {strides = array<i32>} : memref<8x1xf32, #tpu.memory_space<vmem>>, vector<8x1xf32>,
    return
  }
  func.func @transform_0(%arg0: i32) -> (i32, i32) {
    %c0_i32 = arith.constant 0 : i32
    %c0_i32_0 = arith.constant 0 : i32
    return %arg0, %c0_i32 : i32, i32
  }
  func.func @transform_1(%arg0: i32) -> (i32, i32) {
    %c0_i32 = arith.constant 0 : i32
    %c0_i32_0 = arith.constant 0 : i32
    return %arg0, %c0_i32 : i32, i32
  }
  func.func @transform_2(%arg0: i32) -> (i32, i32) {
    %c0_i32 = arith.constant 0 : i32
    %c0_i32_0 = arith.constant 0 : i32
    return %arg0, %c0_i32 : i32, i32
  }
  func.func @transform_3(%arg0: i32) -> (i32, i32) {
    %c0_i32 = arith.constant 0 : i32
    %c0_i32_0 = arith.constant 0 : i32
    return %arg0, %c0_i32 : i32, i32
  }
}

</mosaic_0001>

<bundles_post_ra>
// kernel: tpu_custom_call.1
= control target key start
LH: loop header
LB: loop body
LE: loop exit
PB: predicated region body
PF: predicated region fallthrough
CT: control target
= control target key end

     0   :  { %8 = vsyncpa [#allocation3], 0  ;;  %s119_s12 = smov [#allocation2]   ;;  %s161_s0 = inlined_call_operand.vmem [shape: f32[8,32], index: 0, kind: input, shape index: {}]   ;;  %s162_s1 = inlined_call_operand.hbm [shape: f32[8,32], index: 1, kind: input, shape index: {}]   ;;  %s163_s2 = inlined_call_operand.vmem [shape: f32[8,1], index: 2, kind: input, shape index: {}]   ;;  %s164_s3 = inlined_call_operand.vmem [shape: f32[8,1], index: 3, kind: output, shape index: {}]  }
   0x1   :  { %s17_s13 = sshll.u32 %s119_s12, 4  ;;  %s95_s16 = scalar_lea.hbm %s162_s1, 128  ;;  %s18_s13 = int_to_ptr.vmem [resolvable:$true] %s17_s13 }
   0x2   :  { %p96_p0 = scmp.ne.s32.totalorder %s162_s1, %s95_s16  ;;  %p99_p1 = scmp.lt.u32.totalorder %s95_s16, %s162_s1 }
   0x4   :  { %p101_p2 = pnand %p99_p1, %p96_p0 }
   0x6   :  { %104 = shalt.err (!%p101_p2)
}
   0x7   :  { %s105_s21 = scalar_lea.vmem %s18_s13, 128  ;;  %p110_p4 = scmp.lt.s32.totalorder %s18_s13, %s18_s13 }
   0x8   :  { %p106_p3 = scmp.ne.s32.totalorder %s18_s13, %s105_s21  ;;  %p111_p5 = scmp.lt.s32.totalorder %s105_s21, %s105_s21 }
   0xa   :  { %p112_p6 = por %p111_p5, %p110_p4 }
   0xc   :  { %p113_p7 = pnand %p112_p6, %p106_p3 }
   0xe   :  { %116 = shalt.err (!%p113_p7)
}
   0xf   :  { %20 = dma.hbm_to_vmem [thread:$0]  %s162_s1, 128, %s18_s13, [#allocation3]  }
  0x10   :  { %117 = dma.done.wait [#allocation3], 128  }
  0x11   :  { %118 = vsyncadd [#allocation3], 4294967168  ;;  %v26_v0 = vld [vmem:[%s161_s0] sm:$0xff]  ;;  %vm30_vm0 = vcmask 261120   ;;  %vm79_vm4 = vcmask 7168  }
  0x12   :  { %v27_v1 = vld [vmem:[#allocation2] sm:$0xff]  ;;  %v34_v2 = vmul.f32 %v26_v0, %v26_v0 }
  0x13   :  { %v38_v3 = vmul.f32 %v27_v1, %v27_v1  ;;  %v29_v4 = vmul.f32 %v27_v1, %v26_v0  ;;  %v28_v27 = vld [vmem:[%s163_s2] sm:$0xff] }
  0x14   :  { %v35_v5 = vsel %vm30_vm0, %v34_v2, 0.0 }
  0x15   :  { %v31_v6 = vsel %vm30_vm0, %v29_v4, 0.0  ;;  %36 = vadd.xlane.f32.xlu0 %v35_v5  ;;  %v39_v7 = vsel %vm30_vm0, %v38_v3, 0.0 }
  0x16   :  { %32 = vadd.xlane.f32.xlu1 %v31_v6 }
  0x19   :  { %40 = vadd.xlane.f32.xlu0 %v39_v7 }
  0xa2   :  { %v37_v8 = vpop.xlane.xlu0 %36 }
  0xa3   :  { %v33_v17 = vpop.xlane.xlu1 %32 }
  0xa6   :  { %v41_v9 = vpop.xlane.xlu0 %40 }
  0xa7   :  { %v42_v10 = vmul.f32 %v41_v9, %v37_v8 }
  0xa9   :  { %v43_v11 = vmax.f32 %v42_v10, 1e-16 }
  0xab   :  { %87 = vrsqrt.f32 %v43_v11  ;;  %vm46_vm1 = vcmp.eq.f32.partialorder %v43_v11, inf  ;;  %v49_v14 = vand.u32 2147483648, %v43_v11  ;;  %vm48_vm2 = vcmp.eq.f32.partialorder %v43_v11, 0.0 }
  0xb5   :  { %v88_v12 = vpop.eup %87 }
  0xb6   :  { %v45_v13 = vmul.f32 %v88_v12, %v43_v11 }
  0xb8   :  { %v47_v15 = vsel %vm46_vm1, %v43_v11, %v45_v13 }
  0xb9   :  { %v50_v16 = vsel %vm48_vm2, %v49_v14, %v47_v15 }
  0xba   :  { %89 = vrcp.f32 %v50_v16 }
  0xc4   :  { %v90_v18 = vpop.eup %89 }
  0xc5   :  { %v52_v19 = vmul.f32 %v90_v18, %v33_v17 }
  0xc7   :  { %v54_v20 = vmul.f32 10.0, %v52_v19 }
  0xc9   :  { %v58_v21 = vand.u32 2147483647, %v54_v20  ;;  %v55_v29 = vmax.f32 %v54_v20, 0.0  ;;  %v56_v30 = vmul.f32 %v54_v20, %v28_v27 }
  0xcb   :  { %v59_v22 = vsub.f32 0.0, %v58_v21  ;;  %v57_v35 = vsub.f32 %v55_v29, %v56_v30 }
  0xcd   :  { %v60_v23 = vmul.f32 1.442695, %v59_v22 }
  0xcf   :  { %91 = vpow2.f32 %v60_v23 }
  0xd9   :  { %v92_v24 = vpop.eup %91 }
  0xda   :  { %v62_v25 = vadd.f32 1.0, %v92_v24  ;;  %v65_v26 = vmul.f32 -0.5, %v92_v24  ;;  %v68_v31 = vand.u32 2147483647, %v92_v24 }
  0xdc   :  { %93 = vlog2.f32 %v62_v25  ;;  %v66_v28 = vadd.f32 1.0, %v65_v26  ;;  %vm69_vm3 = vcmp.lt.f32.partialorder %v68_v31, 0.0004427343 }
  0xde   :  { %v67_v34 = vmul.f32 %v92_v24, %v66_v28 }
  0xe6   :  { %v94_v32 = vpop.eup %93 }
  0xe7   :  { %v64_v33 = vmul.f32 0.6931472, %v94_v32 }
  0xe9   :  { %v70_v36 = vsel %vm69_vm3, %v67_v34, %v64_v33 }
  0xea   :  { %v71_v37 = vadd.f32 %v70_v36, %v57_v35 }
  0xec   :  { %80 = vst.msk [vmem:[%s164_s3] sm:$0xff] %vm79_vm4, %v71_v37 }
  0xed   :  { %85 = vsyncpa [#allocation3], 1 }

</bundles_post_ra>
